<compile_context>
chip_gen: v7x
topology: tpu7x:2x2x1
jax: 0.10.0
libtpu: 0.0.40
codegen_flags: <defaults>
</compile_context>

<pallas_src>
import functools

import jax
import jax.numpy as jnp
from jax.experimental import pallas as pl
from jax.experimental.pallas import tpu as pltpu

STATE_SPACE = 2     # env.state_space
ACTION_SPACE = 4    # env.action_space
NUM_HIDDEN = 100
DROP_P = 0.5

# padded kernel shapes (aligned to (8, 128) vreg tiling)
B_TILE = 8          # batch tile (sublane-aligned)
S_PAD = 8           # padded input-feature dim (block == full array, 16x less W1^T bytes)
H_PAD = 128         # padded hidden dim (lane-aligned)
A_PAD = 128         # padded action dim (lane-dense output stores)


def _policy_body(x_ref, w1t_ref, w2t_ref, o_ref, keep_ref):
    x = x_ref[...]          # (B_TILE, S_PAD)
    w1t = w1t_ref[...]      # (S_PAD, H_PAD), rows >= 2 are zero

    # Linear 1 (no bias), contraction depth K = 2: do it on the VPU as an
    # outer-product sum (two vmul + one vadd) instead of the MXU.
    h = x[:, 0:1] * w1t[0:1, :] + x[:, 1:2] * w1t[1:2, :]   # (B_TILE, H_PAD)

    # Dropout(p=0.5), training mode: inverted scaling like torch.nn.Dropout.
    # TODO(synk): mask comes from jax.random (not torch's RNG stream); the
    # distribution matches but exact per-element draws differ from PyTorch.
    if keep_ref is not None:
        h = h * keep_ref[...] * (1.0 / (1.0 - DROP_P))

    # Tanh  [EUP]
    t = jnp.tanh(h)

    # Linear 2 (no bias): (B_TILE, H_PAD) @ (H_PAD, A_PAD)  [MXU]
    logits = jnp.dot(t, w2t_ref[...], preferred_element_type=jnp.float32)

    # Mask padded action lanes so softmax normalizes over the 4 real actions.
    col = jax.lax.broadcasted_iota(jnp.int32, logits.shape, 1)
    logits = jnp.where(col < ACTION_SPACE, logits, -1e30)

    # Softmax(dim=-1)
    m = jnp.max(logits, axis=-1, keepdims=True)
    p = jnp.exp(logits - m)
    o_ref[...] = p / jnp.sum(p, axis=-1, keepdims=True)


def _policy_kernel_train(x_ref, w1t_ref, w2t_ref, keep_ref, o_ref):
    _policy_body(x_ref, w1t_ref, w2t_ref, o_ref, keep_ref)


def _policy_kernel_eval(x_ref, w1t_ref, w2t_ref, o_ref):
    _policy_body(x_ref, w1t_ref, w2t_ref, o_ref, None)


def prepare_policy_params(w1, w2):
    """Pad weights ONCE (per parameter update), not per forward call."""
    w1t = jnp.zeros((S_PAD, H_PAD), jnp.float32).at[:STATE_SPACE, :NUM_HIDDEN].set(
        jnp.asarray(w1, jnp.float32).T)
    w2t = jnp.zeros((H_PAD, A_PAD), jnp.float32).at[:NUM_HIDDEN, :ACTION_SPACE].set(
        jnp.asarray(w2, jnp.float32).T)
    return w1t, w2t


@functools.partial(jax.jit, static_argnames=("training",))
def policy_forward(x, w1t_pad, w2t_pad, rng_key=None, training=True):
    """x: (B, 2) f32. w1t_pad/w2t_pad from prepare_policy_params.

    Returns (B, 4) action probabilities.
    """
    B = x.shape[0]
    n_tiles = pl.cdiv(B, B_TILE)
    B_pad = n_tiles * B_TILE

    x_p = jnp.zeros((B_pad, S_PAD), jnp.float32).at[:B, :STATE_SPACE].set(
        x.astype(jnp.float32))

    in_specs = [
        pl.BlockSpec((B_TILE, S_PAD), lambda i: (i, 0)),   # x tile
        pl.BlockSpec((S_PAD, H_PAD), lambda i: (0, 0)),    # W1^T (resident)
        pl.BlockSpec((H_PAD, A_PAD), lambda i: (0, 0)),    # W2^T (resident)
    ]
    args = [x_p, w1t_pad, w2t_pad]

    if training:
        keep = jax.random.bernoulli(
            rng_key, 1.0 - DROP_P, (B_pad, H_PAD)).astype(jnp.float32)
        in_specs.append(pl.BlockSpec((B_TILE, H_PAD), lambda i: (i, 0)))
        args.append(keep)
        kernel = _policy_kernel_train
    else:
        kernel = _policy_kernel_eval

    out = pl.pallas_call(
        kernel,
        out_shape=jax.ShapeDtypeStruct((B_pad, A_PAD), jnp.float32),
        grid=(n_tiles,),
        in_specs=in_specs,
        out_specs=pl.BlockSpec((B_TILE, A_PAD), lambda i: (i, 0)),
        compiler_params=pltpu.CompilerParams(
            dimension_semantics=("parallel",)),   # v7x: shard batch tiles over 2 TCs
    )(*args)

    return out[:B, :ACTION_SPACE]


if __name__ == "__main__":
    key = jax.random.PRNGKey(0)
    kx, k1, k2, kd, kx2 = jax.random.split(key, 5)

    # Deterministic parameter init (nn.Linear shapes (out, in), no bias),
    # uniform(-1/sqrt(fan_in), 1/sqrt(fan_in)) like PyTorch's default.
    bound1 = 1.0 / (STATE_SPACE ** 0.5)
    bound2 = 1.0 / (NUM_HIDDEN ** 0.5)
    w1 = jax.random.uniform(k1, (NUM_HIDDEN, STATE_SPACE), jnp.float32,
                            -bound1, bound1)
    w2 = jax.random.uniform(k2, (ACTION_SPACE, NUM_HIDDEN), jnp.float32,
                            -bound2, bound2)

    # Pad weights once, outside the per-step path.
    w1t_pad, w2t_pad = prepare_policy_params(w1, w2)

    # Small batch of environment states (state_space = 2).
    batch = 2
    x = jax.random.normal(kx, (batch, STATE_SPACE), jnp.float32)

    # Training-mode forward (dropout active).
    probs_train = jax.block_until_ready(
        policy_forward(x, w1t_pad, w2t_pad, rng_key=kd, training=True))
    assert probs_train.shape == (batch, ACTION_SPACE)
    assert bool(jnp.all(jnp.isfinite(probs_train)))
    assert bool(jnp.all(probs_train >= 0.0))
    assert jnp.allclose(jnp.sum(probs_train, axis=-1), 1.0, atol=1e-5)

    # Eval-mode forward (dropout = identity) vs pure-JAX reference.
    probs_eval = jax.block_until_ready(
        policy_forward(x, w1t_pad, w2t_pad, training=False))
    ref = jax.nn.softmax(jnp.tanh(x @ w1.T) @ w2.T, axis=-1)
    assert jnp.allclose(probs_eval, ref, atol=1e-5, rtol=1e-5)

    # Larger batch exercises the multi-tile batch grid (B > 8).
    batch2 = 10
    x2 = jax.random.normal(kx2, (batch2, STATE_SPACE), jnp.float32)
    probs_eval2 = jax.block_until_ready(
        policy_forward(x2, w1t_pad, w2t_pad, training=False))
    ref2 = jax.nn.softmax(jnp.tanh(x2 @ w1.T) @ w2.T, axis=-1)
    assert probs_eval2.shape == (batch2, ACTION_SPACE)
    assert jnp.allclose(probs_eval2, ref2, atol=1e-5, rtol=1e-5)

    print("KERNEL_OK")
</pallas_src>

<mosaic_0001>
module attributes {stable_mosaic.version = 11 : i64} {
  func.func @_policy_kernel_train(%arg0: i32, %arg1: memref<8x8xf32, #tpu.memory_space<vmem>>, %arg2: memref<8x128xf32, #tpu.memory_space<vmem>>, %arg3: memref<128x128xf32, #tpu.memory_space<vmem>>, %arg4: memref<8x128xf32, #tpu.memory_space<vmem>>, %arg5: memref<8x128xf32, #tpu.memory_space<vmem>>) attributes {dimension_semantics = [#tpu.dimension_semantics<parallel>], iteration_bounds = array<i64: 1>, scalar_prefetch = 0 : i64, scratch_operands = 0 : i64, tpu.core_type = #tpu.core_type<tc>, window_params = [{transform_indices = @transform_0, window_bounds = array<i64: 8, 8>}, {pipeline_mode = #tpu.pipeline_mode<synchronous>, transform_indices = @transform_1, window_bounds = array<i64: 8, 128>}, {pipeline_mode = #tpu.pipeline_mode<synchronous>, transform_indices = @transform_2, window_bounds = array<i64: 128, 128>}, {transform_indices = @transform_3, window_bounds = array<i64: 8, 128>}, {transform_indices = @transform_4, window_bounds = array<i64: 8, 128>}]} {
    %c0 = arith.constant 0 : index
    %c0_0 = arith.constant 0 : index
    %0 = vector.load %arg1[%c0, %c0_0] : memref<8x8xf32, #tpu.memory_space<vmem>>, vector<8x8xf32>
    %c0_1 = arith.constant 0 : index
    %c0_2 = arith.constant 0 : index
    %1 = vector.load %arg2[%c0_1, %c0_2] : memref<8x128xf32, #tpu.memory_space<vmem>>, vector<8x128xf32>
    %2 = vector.extract_strided_slice %0 {offsets = [0, 0], sizes = [8, 1], strides = [1, 1]} : vector<8x8xf32> to vector<8x1xf32>
    %3 = vector.extract_strided_slice %1 {offsets = [0, 0], sizes = [1, 128], strides = [1, 1]} : vector<8x128xf32> to vector<1x128xf32>
    %4 = vector.broadcast %2 : vector<8x1xf32> to vector<8x128xf32>
    %5 = vector.broadcast %3 : vector<1x128xf32> to vector<8x128xf32>
    %6 = arith.mulf %4, %5 : vector<8x128xf32>
    %7 = vector.extract_strided_slice %0 {offsets = [0, 1], sizes = [8, 1], strides = [1, 1]} : vector<8x8xf32> to vector<8x1xf32>
    %8 = vector.extract_strided_slice %1 {offsets = [1, 0], sizes = [1, 128], strides = [1, 1]} : vector<8x128xf32> to vector<1x128xf32>
    %9 = vector.broadcast %7 : vector<8x1xf32> to vector<8x128xf32>
    %10 = vector.broadcast %8 : vector<1x128xf32> to vector<8x128xf32>
    %11 = arith.mulf %9, %10 : vector<8x128xf32>
    %12 = arith.addf %6, %11 : vector<8x128xf32>
    %c0_3 = arith.constant 0 : index
    %c0_4 = arith.constant 0 : index
    %13 = vector.load %arg4[%c0_3, %c0_4] : memref<8x128xf32, #tpu.memory_space<vmem>>, vector<8x128xf32>
    %14 = arith.mulf %12, %13 : vector<8x128xf32>
    %cst = arith.constant 2.000000e+00 : f32
    %15 = vector.broadcast %cst : f32 to vector<8x128xf32>
    %16 = arith.mulf %14, %15 : vector<8x128xf32>
    %17 = math.tanh %16 : vector<8x128xf32>
    %c0_5 = arith.constant 0 : index
    %c0_6 = arith.constant 0 : index
    %18 = vector.load %arg3[%c0_5, %c0_6] : memref<128x128xf32, #tpu.memory_space<vmem>>, vector<128x128xf32>
    %cst_7 = arith.constant dense<0.000000e+00> : vector<8x128xf32>
    %19 = tpu.matmul %17, %18, %cst_7 {dimension_numbers = #tpu.dot_dimension_numbers<[1], [0], [0], [1], [0, 0, 1, 1], [], []>} : vector<8x128xf32>, vector<128x128xf32>, vector<8x128xf32> -> vector<8x128xf32>
    %20 = tpu.iota {dimensions = array<i32: 1>} : vector<8x128xi32>
    %c4_i32 = arith.constant 4 : i32
    %21 = vector.broadcast %c4_i32 : i32 to vector<8x128xi32>
    %22 = arith.cmpi slt, %20, %21 : vector<8x128xi32>
    %cst_8 = arith.constant -1.000000e+30 : f32
    %23 = vector.broadcast %cst_8 : f32 to vector<8x128xf32>
    %24 = arith.select %22, %19, %23 : vector<8x128xi1>, vector<8x128xf32>
    %cst_9 = arith.constant dense<0xFF800000> : vector<8xf32>
    %25 = vector.multi_reduction <maximumf>, %24, %cst_9 [1] : vector<8x128xf32> to vector<8xf32>
    %26 = vector.shape_cast %25 : vector<8xf32> to vector<8x1xf32>
    %27 = vector.broadcast %26 : vector<8x1xf32> to vector<8x128xf32>
    %28 = arith.subf %24, %27 : vector<8x128xf32>
    %29 = math.exp %28 : vector<8x128xf32>
    %cst_10 = arith.constant dense<0.000000e+00> : vector<8xf32>
    %30 = vector.multi_reduction <add>, %29, %cst_10 [1] : vector<8x128xf32> to vector<8xf32>
    %31 = vector.shape_cast %30 : vector<8xf32> to vector<8x1xf32>
    %32 = vector.broadcast %31 : vector<8x1xf32> to vector<8x128xf32>
    %33 = arith.divf %29, %32 : vector<8x128xf32>
    %c0_11 = arith.constant 0 : index
    %c0_12 = arith.constant 0 : index
    %34 = vector.load %arg5[%c0_11, %c0_12] : memref<8x128xf32, #tpu.memory_space<vmem>>, vector<8x128xf32>
    tpu.vector_store %arg5[%c0_11, %c0_12], %33 {strides = array<i32>} : memref<8x128xf32, #tpu.memory_space<vmem>>, vector<8x128xf32>,
    return
  }
  func.func @transform_0(%arg0: i32) -> (i32, i32) {
    %c0_i32 = arith.constant 0 : i32
    %c0_i32_0 = arith.constant 0 : i32
    return %arg0, %c0_i32 : i32, i32
  }
  func.func @transform_1(%arg0: i32) -> (i32, i32) {
    %c0_i32 = arith.constant 0 : i32
    %c0_i32_0 = arith.constant 0 : i32
    %c0_i32_1 = arith.constant 0 : i32
    return %c0_i32, %c0_i32_0 : i32, i32
  }
  func.func @transform_2(%arg0: i32) -> (i32, i32) {
    %c0_i32 = arith.constant 0 : i32
    %c0_i32_0 = arith.constant 0 : i32
    %c0_i32_1 = arith.constant 0 : i32
    return %c0_i32, %c0_i32_0 : i32, i32
  }
  func.func @transform_3(%arg0: i32) -> (i32, i32) {
    %c0_i32 = arith.constant 0 : i32
    %c0_i32_0 = arith.constant 0 : i32
    return %arg0, %c0_i32 : i32, i32
  }
  func.func @transform_4(%arg0: i32) -> (i32, i32) {
    %c0_i32 = arith.constant 0 : i32
    %c0_i32_0 = arith.constant 0 : i32
    return %arg0, %c0_i32 : i32, i32
  }
}

</mosaic_0001>

<bundles_post_ra>
// kernel: policy_forward.1
= control target key start
LH: loop header
LB: loop body
LE: loop exit
PB: predicated region body
PF: predicated region fallthrough
CT: control target
= control target key end

     0   :  { %9 = vsyncpa [#allocation3], 0  ;;  %s278_s15 = smov [#allocation2]   ;;  %s335_s0 = inlined_call_operand.vmem [shape: f32[8,8], index: 0, kind: input, shape index: {}]   ;;  %s336_s1 = inlined_call_operand.vmem [shape: f32[8,128], index: 1, kind: input, shape index: {}]   ;;  %s337_s2 = inlined_call_operand.hbm [shape: f32[128,128], index: 2, kind: input, shape index: {}]   ;;  %s338_s3 = inlined_call_operand.vmem [shape: f32[8,128], index: 3, kind: input, shape index: {}]   ;;  %s339_s4 = inlined_call_operand.vmem [shape: f32[8,128], index: 4, kind: output, shape index: {}]  }
   0x1   :  { %s19_s16 = sshll.u32 %s278_s15, 4  ;;  %s254_s19 = scalar_lea.hbm %s337_s2, 2048  ;;  %s20_s16 = int_to_ptr.vmem [resolvable:$true] %s19_s16 }
   0x2   :  { %p255_p0 = scmp.ne.s32.totalorder %s337_s2, %s254_s19  ;;  %p258_p1 = scmp.lt.u32.totalorder %s254_s19, %s337_s2 }
   0x4   :  { %p260_p2 = pnand %p258_p1, %p255_p0 }
   0x6   :  { %263 = shalt.err (!%p260_p2)
}
   0x7   :  { %s264_s24 = scalar_lea.vmem %s20_s16, 2048  ;;  %p269_p4 = scmp.lt.s32.totalorder %s20_s16, %s20_s16 }
   0x8   :  { %p265_p3 = scmp.ne.s32.totalorder %s20_s16, %s264_s24  ;;  %p270_p5 = scmp.lt.s32.totalorder %s264_s24, %s264_s24 }
   0xa   :  { %p271_p6 = por %p270_p5, %p269_p4 }
   0xc   :  { %p272_p7 = pnand %p271_p6, %p265_p3 }
   0xe   :  { %275 = shalt.err (!%p272_p7)
}
   0xf   :  { %s279_s25 = smov 128   ;;  %s280_s26 = smov 8  }
  0x10   :  { %25 = dma.hbm_to_vmem [thread:$0]  %s337_s2, 2048, %s20_s16, [#allocation3], %s279_s25, %s279_s25, %s280_s26  }
  0x11   :  { %276 = dma.done.wait [#allocation3], 2048  }
  0x12   :  { %277 = vsyncadd [#allocation3], 4294965248  ;;  %v281_v0 = vmov 0   ;;  %v282_v1 = vmov 0.0|0.0   ;;  %v31_v2 = vld [vmem:[%s335_s0] sm:$0xff]  ;;  %v58_v4 = vld [vmem:[#allocation2 + $0x8] sm:$0xff]  ;;  %v38_v29 = vlaneseq }
  0x13   :  { %246 = vset.pattern.permute.xlu0 %v281_v0  ;;  %214 = vmatprep.subr.bf16.mxu0 %v282_v1  ;;  %v57_v3 = vld [vmem:[#allocation2] sm:$0xff]  ;;  %v59_v6 = vld [vmem:[#allocation2 + $0x10] sm:$0xff]  ;;  %v60_v7 = vld [vmem:[#allocation2 + $0x18] sm:$0xff]  ;;  %v283_v11 = vmov 1   ;;  %vm284_vm0 = vmmov 0   ;;  %v285_v19 = vmov 0.0  }
  0x14   :  { %35 = vperm.xlu0 %246, %v31_v2   ;;  %v215_v5 = vpack.c.bf16 %v58_v4, %v57_v3  ;;  %v218_v8 = vpack.c.bf16 %v60_v7, %v59_v6  ;;  %v61_v9 = vld [vmem:[#allocation2 + $0x20] sm:$0xff]  ;;  %v62_v10 = vld [vmem:[#allocation2 + $0x28] sm:$0xff]  ;;  %v63_v13 = vld [vmem:[#allocation2 + $0x30] sm:$0xff]  ;;  %211 = vmatprep.mubr.msk.f32.mxu0 %vm284_vm0, %v285_v19  ;;  %v39_v30 = vshrl.u32 %v38_v29, 7  ;;  %v144_v45 = vand.u32 127, %v38_v29 }
  0x15   :  { %v221_v12 = vpack.c.bf16 %v62_v10, %v61_v9  ;;  %v64_v14 = vld [vmem:[#allocation2 + $0x38] sm:$0xff]  ;;  %v65_v16 = vld [vmem:[#allocation2 + $0x40] sm:$0xff]  ;;  %v66_v17 = vld [vmem:[#allocation2 + $0x48] sm:$0xff] }
  0x16   :  { %216 = vmatpush3.bf16.msra.mxu0 %v215_v5  ;;  %v224_v15 = vpack.c.bf16 %v64_v14, %v63_v13  ;;  %v227_v18 = vpack.c.bf16 %v66_v17, %v65_v16  ;;  %v67_v20 = vld [vmem:[#allocation2 + $0x50] sm:$0xff]  ;;  %v68_v21 = vld [vmem:[#allocation2 + $0x58] sm:$0xff]  ;;  %v69_v23 = vld [vmem:[#allocation2 + $0x60] sm:$0xff]  ;;  %v40_v31 = vsub.s32 0, %v39_v30  ;;  %v49_v32 = vsub.s32 1, %v39_v30 }
  0x17   :  { %217 = vmatprep.subr.bf16.mxu0 %v282_v1  ;;  %v230_v22 = vpack.c.bf16 %v68_v21, %v67_v20  ;;  %v70_v24 = vld [vmem:[#allocation2 + $0x68] sm:$0xff]  ;;  %v71_v26 = vld [vmem:[#allocation2 + $0x70] sm:$0xff]  ;;  %v72_v27 = vld [vmem:[#allocation2 + $0x78] sm:$0xff]  ;;  %vm145_vm1 = vcmp.lt.s32.totalorder %v144_v45, 4 }
  0x18   :  { %247 = vset.pattern.permute.xlu0 %v283_v11  ;;  %v233_v25 = vpack.c.bf16 %v70_v24, %v69_v23  ;;  %v236_v28 = vpack.c.bf16 %v72_v27, %v71_v26  ;;  %v32_v33 = vld [vmem:[%s336_s1] sm:$0xff] }
  0x19   :  { %44 = vperm.xlu0 %247, %v31_v2   ;;  %v41_v35 = vrot.slane %v32_v33, %v40_v31  ;;  %v50_v36 = vrot.slane %v32_v33, %v49_v32  ;;  %v53_v40 = vld [vmem:[%s338_s3] sm:$0xff] }
  0x1a   :  { %219 = vmatpush3.bf16.msra.mxu0 %v218_v8 }
  0x1b   :  { %220 = vmatprep.subr.bf16.mxu0 %v282_v1 }
  0x1e   :  { %222 = vmatpush3.bf16.msra.mxu0 %v221_v12 }
  0x1f   :  { %223 = vmatprep.subr.bf16.mxu0 %v282_v1 }
  0x22   :  { %225 = vmatpush3.bf16.msra.mxu0 %v224_v15 }
  0x23   :  { %226 = vmatprep.subr.bf16.mxu0 %v282_v1 }
  0x26   :  { %228 = vmatpush3.bf16.msra.mxu0 %v227_v18 }
  0x27   :  { %229 = vmatprep.subr.bf16.mxu0 %v282_v1 }
  0x2a   :  { %231 = vmatpush3.bf16.msra.mxu0 %v230_v22 }
  0x2b   :  { %232 = vmatprep.subr.bf16.mxu0 %v282_v1 }
  0x2e   :  { %234 = vmatpush3.bf16.msra.mxu0 %v233_v25 }
  0x2f   :  { %235 = vmatprep.subr.bf16.mxu0 %v282_v1 }
  0x32   :  { %237 = vmatpush3.bf16.msra.mxu0 %v236_v28 }
  0x93   :  { %v36_v34 = vpop.permute.xlu0 %35 }
  0x94   :  { %v42_v38 = vmul.f32 %v41_v35, %v36_v34 }
  0x98   :  { %v45_v37 = vpop.permute.xlu0 %44 }
  0x99   :  { %v51_v39 = vmul.f32 %v50_v36, %v45_v37 }
  0x9b   :  { %v52_v41 = vadd.f32 %v51_v39, %v42_v38 }
  0x9d   :  { %v54_v42 = vmul.f32 %v53_v40, %v52_v41 }
  0x9f   :  { %v55_v43 = vmul.f32 2.0, %v54_v42 }
  0xa1   :  { %248 = vtanh.f32 %v55_v43 }
  0xab   :  { %v249_v44 = vpop.eup %248 }
  0xac   :  { %212 = vmatmul.mubr.f32.vlgmr.msra.gmra.mrb[0].mxu0 %v249_v44 }
 0x17f   :  { %v139_v46 = vpop.f32.mrb[0].mxu0 }
 0x180   :  { %v213_v47 = vpop.f32.mrb[1].mxu0  ;;  %v146_v48 = vsel %vm145_vm1, %v139_v46, -1e+30 }
 0x181   :  { %147 = vmax.xlane.f32.xlu1 %v146_v48 }
 0x20e   :  { %v148_v49 = vpop.xlane.xlu1 %147 }
 0x20f   :  { %v149_v50 = vsub.f32 %v146_v48, %v148_v49 }
 0x211   :  { %v150_v51 = vmul.f32 1.442695, %v149_v50 }
 0x213   :  { %250 = vpow2.f32 %v150_v51 }
 0x21d   :  { %v251_v52 = vpop.eup %250 }
 0x21e   :  { %152 = vadd.xlane.f32.xlu1 %v251_v52 }
 0x2ab   :  { %v153_v53 = vpop.xlane.xlu1 %152 }
 0x2ac   :  { %252 = vrcp.f32 %v153_v53 }
 0x2b6   :  { %v253_v54 = vpop.eup %252 }
 0x2b7   :  { %v155_v55 = vmul.f32 %v253_v54, %v251_v52 }
 0x2b9   :  { %156 = vst [vmem:[%s339_s4] sm:$0xff] %v155_v55 }
 0x2ba   :  { %161 = vsyncpa [#allocation3], 1 }

</bundles_post_ra>
